<compile_context>
chip_gen: v6e
topology: v6e:2x2x1
jax: 0.10.0
libtpu: 0.0.40
codegen_flags: <defaults>
</compile_context>

<pallas_src>
import functools

import jax
import jax.numpy as jnp
from jax.experimental import pallas as pl
from jax.experimental.pallas import tpu as pltpu


# ----------------------------- activations ---------------------------------

_ACT = {
    None: lambda x: x,
    "relu": lambda x: jnp.maximum(x, 0.0),
    "relu6": lambda x: jnp.clip(x, 0.0, 6.0),
    "sigmoid": jax.nn.sigmoid,
}


def _make_out_act(sigmoid, tanh):
    def out_act(x):
        if sigmoid:
            x = jax.nn.sigmoid(x)
        if tanh:
            x = jnp.tanh(x)
        return x
    return out_act


# ------------------------------- kernels ------------------------------------

def _affine_kernel(x_ref, w_ref, b_ref, o_ref, *, out_act):
    # Single fused matmul for the (folded) affine eval-mode network.
    acc = jnp.dot(x_ref[...], w_ref[...], preferred_element_type=jnp.float32)
    o_ref[...] = out_act(acc + b_ref[...]).astype(o_ref.dtype)


def _mlp3_kernel(x_ref, w1_ref, b1_ref, w2_ref, b2_ref, w3_ref, b3_ref, o_ref,
                 *, act, out_act):
    # Layer 1: [TB, dim_in] @ [dim_in, H] + [1, H]
    h = jnp.dot(x_ref[...], w1_ref[...],
                preferred_element_type=jnp.float32) + b1_ref[...]
    h = act(h)
    # (Dropout -> identity in eval mode)
    # Layer 2: [TB, H] @ [H, H] + [1, H]
    h = jnp.dot(h.astype(w2_ref.dtype), w2_ref[...],
                preferred_element_type=jnp.float32) + b2_ref[...]
    h = act(h)
    # (Dropout -> identity in eval mode)
    # Layer 3: [TB, H] @ [H, dim_pred] + [1, dim_pred]
    o = jnp.dot(h.astype(w3_ref.dtype), w3_ref[...],
                preferred_element_type=jnp.float32) + b3_ref[...]
    o_ref[...] = out_act(o).astype(o_ref.dtype)


# ------------------------------- wrapper -------------------------------------

_MIN_BLOCK_ROWS = 512     # below this the ~0.35us/grid-step overhead dominates


def _round_up(x, m):
    return (x + m - 1) // m * m


def _pick_block_rows(batch, dim_in, itemsize, target_bytes=8 << 20):
    # ~8 MiB per x buffer => ~16 MiB double-buffered (+ tiny weights/out):
    # fits the 32 MiB scoped-VMEM limit on v5e/v6e/v7x and amortizes the
    # per-grid-step overhead even at v7x's ~3.2 TB/s HBM.
    cap = max(_MIN_BLOCK_ROWS, (target_bytes // (dim_in * itemsize)) // 8 * 8)
    return min(cap, _round_up(batch, 8))


def mlp_forward(x, params, *, act_layer=None, sigmoid=False, tanh=False,
                block_rows=None):
    """Eval-mode MLP forward.

    x: [B, dim_in] (streamed in its own dtype; pass bf16 upstream for bf16
    streaming).  params = (w1, b1, w2, b2, w3, b3) with weights already
    transposed to [in, out] and biases shaped [1, out].
    """
    w1, b1, w2, b2, w3, b3 = params
    B, dim_in = x.shape
    dim_pred = w3.shape[1]

    out_act = _make_out_act(sigmoid, tanh)
    act = _ACT[act_layer]

    # Stream x as-is: never cast x in the wrapper (would add a full HBM pass).
    stream_dtype = x.dtype
    itemsize = jnp.dtype(stream_dtype).itemsize
    if block_rows is None:
        tb = _pick_block_rows(B, dim_in, itemsize)
    else:
        tb = min(_round_up(B, 8), max(_MIN_BLOCK_ROWS, _round_up(block_rows, 8)))

    grid = (pl.cdiv(B, tb),)   # ragged edge block handled by Pallas (no pad)

    # x / out tiled over batch; weights & biases resident across all grid steps.
    x_spec = pl.BlockSpec((tb, dim_in), lambda i: (i, 0))
    o_spec = pl.BlockSpec((tb, dim_pred), lambda i: (i, 0))
    full = lambda shape: pl.BlockSpec(shape, lambda i: (0,) * len(shape))

    cparams = pltpu.CompilerParams(
        dimension_semantics=("parallel",),   # megacore sharding on v7x
        vmem_limit_bytes=32 << 20,           # explicit (v5e scoped default is 16 MiB)
    )
    out_shape = jax.ShapeDtypeStruct((B, dim_pred), jnp.float32)

    if act_layer is None:
        # Eval-mode network is affine (dropout identity, no norm/act):
        # fold the three Linear layers into one matmul on the host (f32 fold).
        w1f, w2f, w3f = (w.astype(jnp.float32) for w in (w1, w2, w3))
        b1f, b2f, b3f = (b.astype(jnp.float32) for b in (b1, b2, b3))
        w_fold = (w1f @ w2f @ w3f).astype(stream_dtype)   # [dim_in, dim_pred]
        b_fold = (b1f @ w2f + b2f) @ w3f + b3f            # [1, dim_pred] (f32)

        kernel = functools.partial(_affine_kernel, out_act=out_act)
        return pl.pallas_call(
            kernel,
            out_shape=out_shape,
            grid=grid,
            in_specs=[x_spec, full(w_fold.shape), full(b_fold.shape)],
            out_specs=o_spec,
            compiler_params=cparams,
        )(x, w_fold, b_fold)

    # Non-affine path: keep the 3 matmuls in one kernel pass over x.
    w1c, w2c, w3c = (w.astype(stream_dtype) for w in (w1, w2, w3))
    b1f, b2f, b3f = (b.astype(jnp.float32) for b in (b1, b2, b3))

    kernel = functools.partial(_mlp3_kernel, act=act, out_act=out_act)
    return pl.pallas_call(
        kernel,
        out_shape=out_shape,
        grid=grid,
        in_specs=[x_spec,
                  full(w1c.shape), full(b1f.shape),
                  full(w2c.shape), full(b2f.shape),
                  full(w3c.shape), full(b3f.shape)],
        out_specs=o_spec,
        compiler_params=cparams,
    )(x, w1c, b1f, w2c, b2f, w3c, b3f)


# ------------------------------ init / reference -----------------------------

def init_params(key, dim_in=256, dim_hidden=32, dim_pred=1):
    """PyTorch-Linear-style init (uniform +/- 1/sqrt(fan_in)).

    Returns weights transposed to [in, out] and biases as [1, out].
    """
    ks = jax.random.split(key, 6)

    def linear(kw, kb, fan_in, fan_out):
        bound = 1.0 / jnp.sqrt(fan_in)
        w = jax.random.uniform(kw, (fan_in, fan_out), jnp.float32, -bound, bound)
        b = jax.random.uniform(kb, (1, fan_out), jnp.float32, -bound, bound)
        return w, b

    w1, b1 = linear(ks[0], ks[1], dim_in, dim_hidden)
    w2, b2 = linear(ks[2], ks[3], dim_hidden, dim_hidden)
    w3, b3 = linear(ks[4], ks[5], dim_hidden, dim_pred)
    return w1, b1, w2, b2, w3, b3


def ref_mlp(x, params, act_layer=None, sigmoid=False, tanh=False):
    w1, b1, w2, b2, w3, b3 = params
    act = _ACT[act_layer]
    x = x.astype(jnp.float32)
    h = act(x @ w1 + b1)
    h = act(h @ w2 + b2)
    o = h @ w3 + b3
    return _make_out_act(sigmoid, tanh)(o)


# --------------------------------- main ---------------------------------------

if __name__ == "__main__":
    key = jax.random.PRNGKey(0)
    k_x, k_p, k_x2 = jax.random.split(key, 3)

    B, DIM_IN, DIM_HIDDEN, DIM_PRED = 8, 256, 32, 1
    x = jax.random.normal(k_x, (B, DIM_IN), jnp.float32)
    params = init_params(k_p, DIM_IN, DIM_HIDDEN, DIM_PRED)

    # 1) Default config (affine / folded path), f32 streaming, single tile.
    out = jax.block_until_ready(mlp_forward(x, params))
    ref = ref_mlp(x, params)
    assert out.shape == (B, DIM_PRED)
    assert jnp.allclose(out, ref, atol=1e-4, rtol=1e-4), "f32 folded path mismatch"

    # 2) x already bf16 upstream -> bf16 streaming (f32 MXU accumulation),
    #    no wrapper-side cast of x.  Looser tolerance vs the f32 reference.
    x_bf16 = x.astype(jnp.bfloat16)
    out_bf16 = jax.block_until_ready(mlp_forward(x_bf16, params))
    assert jnp.allclose(out_bf16, ref, atol=3e-2, rtol=3e-2), "bf16 path mismatch"

    # 3) Non-affine config (relu) exercises the 3-layer kernel, multi-step grid
    #    and the ragged edge block (no host-side pad): 1100 = 2*512 + 76.
    B2 = 1100
    x2 = jax.random.normal(k_x2, (B2, DIM_IN), jnp.float32)
    out_relu = jax.block_until_ready(
        mlp_forward(x2, params, act_layer="relu", block_rows=512))
    ref_relu = ref_mlp(x2, params, act_layer="relu")
    assert out_relu.shape == (B2, DIM_PRED)
    assert jnp.allclose(out_relu, ref_relu, atol=1e-4, rtol=1e-4), "relu path mismatch"

    print("KERNEL_OK")
</pallas_src>

<mosaic_0001>
module attributes {stable_mosaic.version = 11 : i64} {
  func.func @_affine_kernel(%arg0: i32, %arg1: memref<8x256xf32, #tpu.memory_space<vmem>>, %arg2: memref<256x1xf32, #tpu.memory_space<vmem>>, %arg3: memref<1x1xf32, #tpu.memory_space<vmem>>, %arg4: memref<8x1xf32, #tpu.memory_space<vmem>>) attributes {dimension_semantics = [#tpu.dimension_semantics<parallel>], iteration_bounds = array<i64: 1>, scalar_prefetch = 0 : i64, scratch_operands = 0 : i64, tpu.core_type = #tpu.core_type<tc>, window_params = [{transform_indices = @transform_0, window_bounds = array<i64: 8, 256>}, {pipeline_mode = #tpu.pipeline_mode<synchronous>, transform_indices = @transform_1, window_bounds = array<i64: 256, 1>}, {pipeline_mode = #tpu.pipeline_mode<synchronous>, transform_indices = @transform_2, window_bounds = array<i64: 1, 1>}, {transform_indices = @transform_3, window_bounds = array<i64: 8, 1>}]} {
    %c0 = arith.constant 0 : index
    %c0_0 = arith.constant 0 : index
    %0 = vector.load %arg1[%c0, %c0_0] : memref<8x256xf32, #tpu.memory_space<vmem>>, vector<8x256xf32>
    %c0_1 = arith.constant 0 : index
    %c0_2 = arith.constant 0 : index
    %1 = vector.load %arg2[%c0_1, %c0_2] : memref<256x1xf32, #tpu.memory_space<vmem>>, vector<256x1xf32>
    %cst = arith.constant dense<0.000000e+00> : vector<8x1xf32>
    %2 = tpu.matmul %0, %1, %cst {dimension_numbers = #tpu.dot_dimension_numbers<[1], [0], [0], [1], [0, 0, 1, 1], [], []>} : vector<8x256xf32>, vector<256x1xf32>, vector<8x1xf32> -> vector<8x1xf32>
    %c0_3 = arith.constant 0 : index
    %c0_4 = arith.constant 0 : index
    %3 = vector.load %arg3[%c0_3, %c0_4] : memref<1x1xf32, #tpu.memory_space<vmem>>, vector<1x1xf32>
    %4 = vector.broadcast %3 : vector<1x1xf32> to vector<8x1xf32>
    %5 = arith.addf %2, %4 : vector<8x1xf32>
    %c0_5 = arith.constant 0 : index
    %c0_6 = arith.constant 0 : index
    %6 = vector.load %arg4[%c0_5, %c0_6] : memref<8x1xf32, #tpu.memory_space<vmem>>, vector<8x1xf32>
    tpu.vector_store %arg4[%c0_5, %c0_6], %5 {strides = array<i32>} : memref<8x1xf32, #tpu.memory_space<vmem>>, vector<8x1xf32>,
    return
  }
  func.func @transform_0(%arg0: i32) -> (i32, i32) {
    %c0_i32 = arith.constant 0 : i32
    %c0_i32_0 = arith.constant 0 : i32
    return %arg0, %c0_i32 : i32, i32
  }
  func.func @transform_1(%arg0: i32) -> (i32, i32) {
    %c0_i32 = arith.constant 0 : i32
    %c0_i32_0 = arith.constant 0 : i32
    %c0_i32_1 = arith.constant 0 : i32
    return %c0_i32, %c0_i32_0 : i32, i32
  }
  func.func @transform_2(%arg0: i32) -> (i32, i32) {
    %c0_i32 = arith.constant 0 : i32
    %c0_i32_0 = arith.constant 0 : i32
    %c0_i32_1 = arith.constant 0 : i32
    return %c0_i32, %c0_i32_0 : i32, i32
  }
  func.func @transform_3(%arg0: i32) -> (i32, i32) {
    %c0_i32 = arith.constant 0 : i32
    %c0_i32_0 = arith.constant 0 : i32
    return %arg0, %c0_i32 : i32, i32
  }
}

</mosaic_0001>

<bundles_post_ra>
// kernel: tpu_custom_call.1
= control target key start
LH: loop header
LB: loop body
LE: loop exit
PB: predicated region body
PF: predicated region fallthrough
CT: control target
= control target key end

     0   :  { %vm127_vm0 = vcmask 7168   ;;  %s297_s1 = inlined_call_operand.vmem [shape: f32[256,1], index: 1, kind: input, shape index: {}]   ;;  %s298_s0 = inlined_call_operand.vmem [shape: f32[8,256], index: 0, kind: input, shape index: {}]   ;;  %s299_s2 = inlined_call_operand.<no memory space> [shape: f32[1,1], index: 2, kind: input, shape index: {}]   ;;  %s300_s3 = inlined_call_operand.vmem [shape: f32[8,1], index: 3, kind: output, shape index: {}]  }
   0x1   :  { %v49_v0 = vld [vmem:[%s297_s1 + $0xf8] sm:$0xff]  ;;  %v48_v2 = vld [vmem:[%s297_s1 + $0xf0] sm:$0xff]  ;;  %v47_v4 = vld [vmem:[%s297_s1 + $0xe8] sm:$0xff]  ;;  %v8_v34 = vstv %s299_s2 }
   0x2   :  { %v33_v1 = vld [vmem:[%s297_s1 + $0x78] sm:$0xff]  ;;  %134 = vmatprep.subr.mxu0 %v49_v0  ;;  %v32_v3 = vld [vmem:[%s297_s1 + $0x70] sm:$0xff]  ;;  %v31_v5 = vld [vmem:[%s297_s1 + $0x68] sm:$0xff]  ;;  %9 = vst [vmem:[#allocation2] sm:$0x1] %v8_v34 }
   0x3   :  { %135 = vmatpush3.msra.mxu0 %v33_v1  ;;  %v46_v6 = vld [vmem:[%s297_s1 + $0xe0] sm:$0xff]  ;;  %v45_v8 = vld [vmem:[%s297_s1 + $0xd8] sm:$0xff]  ;;  %v44_v10 = vld [vmem:[%s297_s1 + $0xd0] sm:$0xff] }
   0x4   :  { %136 = vmatprep.subr.mxu0 %v48_v2  ;;  %v30_v7 = vld [vmem:[%s297_s1 + $0x60] sm:$0xff]  ;;  %v29_v9 = vld [vmem:[%s297_s1 + $0x58] sm:$0xff]  ;;  %v28_v11 = vld [vmem:[%s297_s1 + $0x50] sm:$0xff] }
   0x5   :  { %137 = vmatpush3.msra.mxu0 %v32_v3  ;;  %v43_v12 = vld [vmem:[%s297_s1 + $0xc8] sm:$0xff]  ;;  %v42_v15 = vld [vmem:[%s297_s1 + $0xc0] sm:$0xff]  ;;  %v41_v17 = vld [vmem:[%s297_s1 + $0xb8] sm:$0xff] }
   0x6   :  { %138 = vmatprep.subr.mxu0 %v47_v4  ;;  %v17_v13 = vld [vmem:[%s298_s0 + $0x8] sm:$0xff]  ;;  %v26_v16 = vld [vmem:[%s297_s1 + $0x40] sm:$0xff]  ;;  %v25_v18 = vld [vmem:[%s297_s1 + $0x38] sm:$0xff] }
   0x7   :  { %139 = vmatpush3.msra.mxu0 %v31_v5  ;;  %v27_v14 = vld [vmem:[%s297_s1 + $0x48] sm:$0xff]  ;;  %121 = vmatprep.mubr.f32.mxu0 %v17_v13  ;;  %v40_v19 = vld [vmem:[%s297_s1 + $0xb0] sm:$0xff]  ;;  %v38_v23 = vld [vmem:[%s297_s1 + $0xa0] sm:$0xff] }
   0x8   :  { %140 = vmatprep.subr.mxu0 %v46_v6  ;;  %v24_v20 = vld [vmem:[%s297_s1 + $0x30] sm:$0xff]  ;;  %v39_v21 = vld [vmem:[%s297_s1 + $0xa8] sm:$0xff]  ;;  %v22_v24 = vld [vmem:[%s297_s1 + $0x20] sm:$0xff] }
   0x9   :  { %141 = vmatpush3.msra.mxu0 %v30_v7  ;;  %v23_v22 = vld [vmem:[%s297_s1 + $0x28] sm:$0xff]  ;;  %v37_v25 = vld [vmem:[%s297_s1 + $0x98] sm:$0xff]  ;;  %v36_v27 = vld [vmem:[%s297_s1 + $0x90] sm:$0xff] }
   0xa   :  { %142 = vmatprep.subr.mxu0 %v45_v8  ;;  %v21_v26 = vld [vmem:[%s297_s1 + $0x18] sm:$0xff]  ;;  %v20_v28 = vld [vmem:[%s297_s1 + $0x10] sm:$0xff]  ;;  %v35_v29 = vld [vmem:[%s297_s1 + $0x88] sm:$0xff] }
   0xb   :  { %143 = vmatpush3.msra.mxu0 %v29_v9  ;;  %v19_v30 = vld [vmem:[%s297_s1 + $0x8] sm:$0xff]  ;;  %v34_v31 = vld [vmem:[%s297_s1 + $0x80] sm:$0xff] }
   0xc   :  { %144 = vmatprep.subr.mxu0 %v44_v10  ;;  %v18_v32 = vld [vmem:[%s297_s1] sm:$0xff] }
   0xd   :  { %145 = vmatpush3.msra.mxu0 %v28_v11  ;;  %v16_v33 = vld [vmem:[%s298_s0] sm:$0xff] }
   0xe   :  { %146 = vmatprep.subr.mxu0 %v43_v12  ;;  %v133_v36 = vld [vmem:[#allocation2] ss:$0 sm:$0xff] }
   0xf   :  { %147 = vmatpush3.msra.mxu0 %v27_v14 }
  0x10   :  { %148 = vmatprep.subr.mxu0 %v42_v15 }
  0x11   :  { %149 = vmatpush3.msra.mxu0 %v26_v16 }
  0x12   :  { %150 = vmatprep.subr.mxu0 %v41_v17 }
  0x13   :  { %151 = vmatpush3.msra.mxu0 %v25_v18 }
  0x14   :  { %152 = vmatprep.subr.mxu0 %v40_v19 }
  0x15   :  { %153 = vmatpush3.msra.mxu0 %v24_v20 }
  0x16   :  { %154 = vmatprep.subr.mxu0 %v39_v21 }
  0x17   :  { %155 = vmatpush3.msra.mxu0 %v23_v22 }
  0x18   :  { %156 = vmatprep.subr.mxu0 %v38_v23 }
  0x19   :  { %157 = vmatpush3.msra.mxu0 %v22_v24 }
  0x1a   :  { %158 = vmatprep.subr.mxu0 %v37_v25 }
  0x1b   :  { %159 = vmatpush3.msra.mxu0 %v21_v26 }
  0x1c   :  { %160 = vmatprep.subr.mxu0 %v36_v27 }
  0x1d   :  { %161 = vmatpush3.msra.mxu0 %v20_v28 }
  0x1e   :  { %162 = vmatprep.subr.mxu0 %v35_v29 }
  0x1f   :  { %163 = vmatpush3.msra.mxu0 %v19_v30 }
  0x20   :  { %164 = vmatprep.subr.mxu0 %v34_v31 }
  0x21   :  { %165 = vmatpush3.msra.mxu0 %v18_v32 }
  0x22   :  { %122 = vmatmul.mubr.f32.vlgmr.msra.gmra.mxu0 %v16_v33 }
  0xe2   :  { %v166_v35 = vpop.f32.mrf.mxu0 }
  0xe4   :  { %v167_v37 = vpop.f32.mrf.mxu0 }
  0xe5   :  { %v168_v38 = vadd.f32 %v167_v37, %v166_v35 }
  0xe7   :  { %v124_v39 = vadd.f32 %v168_v38, %v133_v36 }
  0xe9   :  { %128 = vst.msk [vmem:[%s300_s3] sm:$0xff] %vm127_vm0, %v124_v39 }

</bundles_post_ra>
